<compile_context>
chip_gen: v5e
topology: v5e:2x2
jax: 0.10.0
libtpu: 0.0.40
codegen_flags: <defaults>
</compile_context>

<pallas_src>
import jax
import jax.numpy as jnp
from jax.experimental import pallas as pl
from jax.experimental.pallas import tpu as pltpu


def _conv1x1_hswish_kernel(w_ref, b_ref, x_ref, o_ref):
    # w_ref: (Cout, Cin) f32 in SMEM;  b_ref: (Cout,) f32 in SMEM
    # x_ref: (1, Cin, TILE_H, Wp) f32 in VMEM
    # o_ref: (1, Cout, TILE_H, Wp) in VMEM
    cin = x_ref.shape[1]
    cout = o_ref.shape[1]

    # Load each input channel plane once (VMEM -> vregs; any spill is cheap
    # vld/vst and this kernel is HBM-bound anyway).
    xs = [x_ref[0, k] for k in range(cin)]            # cin x (TILE_H, Wp)

    for c in range(cout):                             # static unroll, Cout == 8
        # 1x1 conv: t1 = bias[c] + sum_k w[c, k] * x[k]   (VPU scalar*tile FMAs)
        t1 = b_ref[c] + w_ref[c, 0] * xs[0]
        for k in range(1, cin):                       # static unroll, Cin == 3
            t1 = t1 + w_ref[c, k] * xs[k]
        # Fused elementwise epilogue of the module:
        #   t2 = 3 + t1; t4 = relu(t1); t5 = clamp_max(t1, 6)
        #   out = t4 * (t2 + t5) / 6
        t2 = 3.0 + t1
        t4 = jnp.maximum(t1, 0.0)
        t5 = jnp.minimum(t1, 6.0)
        o_ref[0, c] = (t4 * (t2 + t5) * (1.0 / 6.0)).astype(o_ref.dtype)


def _pick_tile_h(n, hp, max_tile_h=256):
    """Choose the row-tile height.

    The second-minor block dim must be a multiple of 8 or equal the full
    extent.  Use one full-extent block per image where possible (fewest grid
    steps); for batch-1 inputs split into >= 2 row blocks so both v7x
    TensorCores get work on the 'parallel' grid axes.
    """
    max_tile_h = max(8, (max_tile_h // 8) * 8)
    if hp <= 8:
        return hp                                     # tiny image: one block
    if n >= 2:
        # Grid already has >= 2 parallel steps over batch.
        return hp if hp <= max_tile_h else max_tile_h
    # n == 1: at least two row blocks, 8-aligned tiles (ragged tail is masked).
    half = -(-hp // 2)                                # ceil(hp / 2)
    tile = -(-half // 8) * 8                          # round up to multiple of 8
    tile = min(tile, max_tile_h)
    if tile >= hp:                                    # safety fallback
        tile = 8
    return tile


def conv1x1_pad1_hswish(x_nchw, weight, bias, *, max_tile_h=256,
                        out_dtype=jnp.float32):
    """x_nchw: (N, Cin, H, W); weight: (Cout, Cin); bias: (Cout,)."""
    n, cin, h, w = x_nchw.shape
    cout = weight.shape[0]
    hp, wp = h + 2, w + 2

    # padding=1 with a 1x1 kernel: border output rows/cols see all-zero input,
    # i.e. they equal epilogue(bias).  One zero-pad of the small 3-channel
    # input produces that naturally and keeps the kernel branch-free.
    xp = jnp.pad(x_nchw.astype(jnp.float32), ((0, 0), (0, 0), (1, 1), (1, 1)))

    w32 = weight.astype(jnp.float32)
    b32 = bias.astype(jnp.float32)

    tile_h = _pick_tile_h(n, hp, max_tile_h)
    num_h_blocks = pl.cdiv(hp, tile_h)

    itemsize_out = jnp.dtype(out_dtype).itemsize
    cost = pl.CostEstimate(
        flops=n * cout * hp * wp * (2 * cin + 5),
        transcendentals=0,
        bytes_accessed=(xp.size * 4 + n * cout * hp * wp * itemsize_out
                        + w32.size * 4 + b32.size * 4),
    )

    return pl.pallas_call(
        _conv1x1_hswish_kernel,
        out_shape=jax.ShapeDtypeStruct((n, cout, hp, wp), out_dtype),
        grid=(n, num_h_blocks),
        in_specs=[
            pl.BlockSpec(memory_space=pltpu.MemorySpace.SMEM),   # weight (tiny)
            pl.BlockSpec(memory_space=pltpu.MemorySpace.SMEM),   # bias (tiny)
            pl.BlockSpec((1, cin, tile_h, wp), lambda b, r: (b, 0, r, 0)),
        ],
        out_specs=pl.BlockSpec((1, cout, tile_h, wp), lambda b, r: (b, 0, r, 0)),
        compiler_params=pltpu.CompilerParams(
            dimension_semantics=("parallel", "parallel")),
        cost_estimate=cost,
    )(w32, b32, xp)


def reference(x_nchw, weight, bias):
    """Pure-JAX reference for correctness checking."""
    xp = jnp.pad(x_nchw, ((0, 0), (0, 0), (1, 1), (1, 1)))
    t1 = jnp.einsum("nchw,oc->nohw", xp, weight) + bias[None, :, None, None]
    t2 = 3.0 + t1
    t4 = jnp.maximum(t1, 0.0)
    t5 = jnp.minimum(t1, 6.0)
    return t4 * (t2 + t5) / 6.0


if __name__ == "__main__":
    key = jax.random.PRNGKey(0)
    kx1, kx2, kw, kb = jax.random.split(key, 4)

    COUT, CIN = 8, 3
    weight = jax.random.normal(kw, (COUT, CIN), dtype=jnp.float32) * (1.0 / 3.0)
    bias = jax.random.normal(kb, (COUT,), dtype=jnp.float32) * 0.1

    # Case 1: small shape, batch 2 -> one full-extent row block per image,
    # grid (2, 1) shards across TensorCores on v7x.
    x_small = jax.random.normal(kx1, (2, CIN, 16, 16), dtype=jnp.float32)
    out_small = jax.block_until_ready(conv1x1_pad1_hswish(x_small, weight, bias))
    ref_small = reference(x_small, weight, bias)
    assert out_small.shape == (2, COUT, 18, 18), out_small.shape
    assert jnp.allclose(out_small, ref_small, atol=1e-5, rtol=1e-5), \
        "mismatch vs reference (small shape)"

    # Case 2: the module's own spec shape (1, 3, 64, 64) -> batch-1 image is
    # split into 2 row blocks (40 + 26 ragged) so both cores get work.
    x_spec = jax.random.normal(kx2, (1, CIN, 64, 64), dtype=jnp.float32)
    out_spec = jax.block_until_ready(conv1x1_pad1_hswish(x_spec, weight, bias))
    ref_spec = reference(x_spec, weight, bias)
    assert out_spec.shape == (1, COUT, 66, 66), out_spec.shape
    assert jnp.allclose(out_spec, ref_spec, atol=1e-5, rtol=1e-5), \
        "mismatch vs reference (spec shape)"

    print("KERNEL_OK")
</pallas_src>

<mosaic_0001>
module attributes {stable_mosaic.version = 11 : i64} {
  func.func @_conv1x1_hswish_kernel(%arg0: i32, %arg1: i32, %arg2: memref<8x3xf32, #tpu.memory_space<smem>>, %arg3: memref<8xf32, #tpu.memory_space<smem>>, %arg4: memref<1x3x18x18xf32, #tpu.memory_space<vmem>>, %arg5: memref<1x8x18x18xf32, #tpu.memory_space<vmem>>) attributes {dimension_semantics = [#tpu.dimension_semantics<parallel>, #tpu.dimension_semantics<parallel>], iteration_bounds = array<i64: 2, 1>, scalar_prefetch = 0 : i64, scratch_operands = 0 : i64, tpu.core_type = #tpu.core_type<tc>, window_params = [{transform_indices = @transform_0, window_bounds = array<i64: 8, 3>}, {transform_indices = @transform_1, window_bounds = array<i64: 8>}, {transform_indices = @transform_2, window_bounds = array<i64: 1, 3, 18, 18>}, {transform_indices = @transform_3, window_bounds = array<i64: 1, 8, 18, 18>}]} {
    %c0 = arith.constant 0 : index
    %c0_0 = arith.constant 0 : index
    %c0_1 = arith.constant 0 : index
    %c0_2 = arith.constant 0 : index
    %0 = vector.load %arg4[%c0, %c0_0, %c0_1, %c0_2] : memref<1x3x18x18xf32, #tpu.memory_space<vmem>>, vector<1x1x18x18xf32>
    %1 = vector.shape_cast %0 : vector<1x1x18x18xf32> to vector<18x18xf32>
    %c0_3 = arith.constant 0 : index
    %c1 = arith.constant 1 : index
    %c0_4 = arith.constant 0 : index
    %c0_5 = arith.constant 0 : index
    %2 = vector.load %arg4[%c0_3, %c1, %c0_4, %c0_5] : memref<1x3x18x18xf32, #tpu.memory_space<vmem>>, vector<1x1x18x18xf32>
    %3 = vector.shape_cast %2 : vector<1x1x18x18xf32> to vector<18x18xf32>
    %c0_6 = arith.constant 0 : index
    %c2 = arith.constant 2 : index
    %c0_7 = arith.constant 0 : index
    %c0_8 = arith.constant 0 : index
    %4 = vector.load %arg4[%c0_6, %c2, %c0_7, %c0_8] : memref<1x3x18x18xf32, #tpu.memory_space<vmem>>, vector<1x1x18x18xf32>
    %5 = vector.shape_cast %4 : vector<1x1x18x18xf32> to vector<18x18xf32>
    %c0_9 = arith.constant 0 : index
    %6 = memref.load %arg3[%c0_9] : memref<8xf32, #tpu.memory_space<smem>>
    %c0_10 = arith.constant 0 : index
    %c0_11 = arith.constant 0 : index
    %7 = memref.load %arg2[%c0_10, %c0_11] : memref<8x3xf32, #tpu.memory_space<smem>>
    %8 = vector.broadcast %7 : f32 to vector<18x18xf32>
    %9 = arith.mulf %8, %1 : vector<18x18xf32>
    %10 = vector.broadcast %6 : f32 to vector<18x18xf32>
    %11 = arith.addf %10, %9 : vector<18x18xf32>
    %c0_12 = arith.constant 0 : index
    %c1_13 = arith.constant 1 : index
    %12 = memref.load %arg2[%c0_12, %c1_13] : memref<8x3xf32, #tpu.memory_space<smem>>
    %13 = vector.broadcast %12 : f32 to vector<18x18xf32>
    %14 = arith.mulf %13, %3 : vector<18x18xf32>
    %15 = arith.addf %11, %14 : vector<18x18xf32>
    %c0_14 = arith.constant 0 : index
    %c2_15 = arith.constant 2 : index
    %16 = memref.load %arg2[%c0_14, %c2_15] : memref<8x3xf32, #tpu.memory_space<smem>>
    %17 = vector.broadcast %16 : f32 to vector<18x18xf32>
    %18 = arith.mulf %17, %5 : vector<18x18xf32>
    %19 = arith.addf %15, %18 : vector<18x18xf32>
    %cst = arith.constant 3.000000e+00 : f32
    %20 = vector.broadcast %cst : f32 to vector<18x18xf32>
    %21 = arith.addf %20, %19 : vector<18x18xf32>
    %cst_16 = arith.constant 0.000000e+00 : f32
    %22 = vector.broadcast %cst_16 : f32 to vector<18x18xf32>
    %23 = arith.maximumf %19, %22 : vector<18x18xf32>
    %cst_17 = arith.constant 6.000000e+00 : f32
    %24 = vector.broadcast %cst_17 : f32 to vector<18x18xf32>
    %25 = arith.minimumf %19, %24 : vector<18x18xf32>
    %26 = arith.addf %21, %25 : vector<18x18xf32>
    %27 = arith.mulf %23, %26 : vector<18x18xf32>
    %cst_18 = arith.constant 0.166666672 : f32
    %28 = vector.broadcast %cst_18 : f32 to vector<18x18xf32>
    %29 = arith.mulf %27, %28 : vector<18x18xf32>
    %c0_19 = arith.constant 0 : index
    %c0_20 = arith.constant 0 : index
    %c0_21 = arith.constant 0 : index
    %c0_22 = arith.constant 0 : index
    %30 = vector.load %arg5[%c0_19, %c0_20, %c0_21, %c0_22] : memref<1x8x18x18xf32, #tpu.memory_space<vmem>>, vector<1x1x18x18xf32>
    %31 = vector.shape_cast %30 : vector<1x1x18x18xf32> to vector<18x18xf32>
    %32 = vector.shape_cast %29 : vector<18x18xf32> to vector<1x1x18x18xf32>
    tpu.vector_store %arg5[%c0_19, %c0_20, %c0_21, %c0_22], %32 {strides = array<i32>} : memref<1x8x18x18xf32, #tpu.memory_space<vmem>>, vector<1x1x18x18xf32>,
    %c1_23 = arith.constant 1 : index
    %33 = memref.load %arg3[%c1_23] : memref<8xf32, #tpu.memory_space<smem>>
    %c1_24 = arith.constant 1 : index
    %c0_25 = arith.constant 0 : index
    %34 = memref.load %arg2[%c1_24, %c0_25] : memref<8x3xf32, #tpu.memory_space<smem>>
    %35 = vector.broadcast %34 : f32 to vector<18x18xf32>
    %36 = arith.mulf %35, %1 : vector<18x18xf32>
    %37 = vector.broadcast %33 : f32 to vector<18x18xf32>
    %38 = arith.addf %37, %36 : vector<18x18xf32>
    %c1_26 = arith.constant 1 : index
    %c1_27 = arith.constant 1 : index
    %39 = memref.load %arg2[%c1_26, %c1_27] : memref<8x3xf32, #tpu.memory_space<smem>>
    %40 = vector.broadcast %39 : f32 to vector<18x18xf32>
    %41 = arith.mulf %40, %3 : vector<18x18xf32>
    %42 = arith.addf %38, %41 : vector<18x18xf32>
    %c1_28 = arith.constant 1 : index
    %c2_29 = arith.constant 2 : index
    %43 = memref.load %arg2[%c1_28, %c2_29] : memref<8x3xf32, #tpu.memory_space<smem>>
    %44 = vector.broadcast %43 : f32 to vector<18x18xf32>
    %45 = arith.mulf %44, %5 : vector<18x18xf32>
    %46 = arith.addf %42, %45 : vector<18x18xf32>
    %cst_30 = arith.constant 3.000000e+00 : f32
    %47 = vector.broadcast %cst_30 : f32 to vector<18x18xf32>
    %48 = arith.addf %47, %46 : vector<18x18xf32>
    %cst_31 = arith.constant 0.000000e+00 : f32
    %49 = vector.broadcast %cst_31 : f32 to vector<18x18xf32>
    %50 = arith.maximumf %46, %49 : vector<18x18xf32>
    %cst_32 = arith.constant 6.000000e+00 : f32
    %51 = vector.broadcast %cst_32 : f32 to vector<18x18xf32>
    %52 = arith.minimumf %46, %51 : vector<18x18xf32>
    %53 = arith.addf %48, %52 : vector<18x18xf32>
    %54 = arith.mulf %50, %53 : vector<18x18xf32>
    %cst_33 = arith.constant 0.166666672 : f32
    %55 = vector.broadcast %cst_33 : f32 to vector<18x18xf32>
    %56 = arith.mulf %54, %55 : vector<18x18xf32>
    %c0_34 = arith.constant 0 : index
    %c1_35 = arith.constant 1 : index
    %c0_36 = arith.constant 0 : index
    %c0_37 = arith.constant 0 : index
    %57 = vector.load %arg5[%c0_34, %c1_35, %c0_36, %c0_37] : memref<1x8x18x18xf32, #tpu.memory_space<vmem>>, vector<1x1x18x18xf32>
    %58 = vector.shape_cast %57 : vector<1x1x18x18xf32> to vector<18x18xf32>
    %59 = vector.shape_cast %56 : vector<18x18xf32> to vector<1x1x18x18xf32>
    tpu.vector_store %arg5[%c0_34, %c1_35, %c0_36, %c0_37], %59 {strides = array<i32>} : memref<1x8x18x18xf32, #tpu.memory_space<vmem>>, vector<1x1x18x18xf32>,
    %c2_38 = arith.constant 2 : index
    %60 = memref.load %arg3[%c2_38] : memref<8xf32, #tpu.memory_space<smem>>
    %c2_39 = arith.constant 2 : index
    %c0_40 = arith.constant 0 : index
    %61 = memref.load %arg2[%c2_39, %c0_40] : memref<8x3xf32, #tpu.memory_space<smem>>
    %62 = vector.broadcast %61 : f32 to vector<18x18xf32>
    %63 = arith.mulf %62, %1 : vector<18x18xf32>
    %64 = vector.broadcast %60 : f32 to vector<18x18xf32>
    %65 = arith.addf %64, %63 : vector<18x18xf32>
    %c2_41 = arith.constant 2 : index
    %c1_42 = arith.constant 1 : index
    %66 = memref.load %arg2[%c2_41, %c1_42] : memref<8x3xf32, #tpu.memory_space<smem>>
    %67 = vector.broadcast %66 : f32 to vector<18x18xf32>
    %68 = arith.mulf %67, %3 : vector<18x18xf32>
    %69 = arith.addf %65, %68 : vector<18x18xf32>
    %c2_43 = arith.constant 2 : index
    %c2_44 = arith.constant 2 : index
    %70 = memref.load %arg2[%c2_43, %c2_44] : memref<8x3xf32, #tpu.memory_space<smem>>
    %71 = vector.broadcast %70 : f32 to vector<18x18xf32>
    %72 = arith.mulf %71, %5 : vector<18x18xf32>
    %73 = arith.addf %69, %72 : vector<18x18xf32>
    %cst_45 = arith.constant 3.000000e+00 : f32
    %74 = vector.broadcast %cst_45 : f32 to vector<18x18xf32>
    %75 = arith.addf %74, %73 : vector<18x18xf32>
    %cst_46 = arith.constant 0.000000e+00 : f32
    %76 = vector.broadcast %cst_46 : f32 to vector<18x18xf32>
    %77 = arith.maximumf %73, %76 : vector<18x18xf32>
    %cst_47 = arith.constant 6.000000e+00 : f32
    %78 = vector.broadcast %cst_47 : f32 to vector<18x18xf32>
    %79 = arith.minimumf %73, %78 : vector<18x18xf32>
    %80 = arith.addf %75, %79 : vector<18x18xf32>
    %81 = arith.mulf %77, %80 : vector<18x18xf32>
    %cst_48 = arith.constant 0.166666672 : f32
    %82 = vector.broadcast %cst_48 : f32 to vector<18x18xf32>
    %83 = arith.mulf %81, %82 : vector<18x18xf32>
    %c0_49 = arith.constant 0 : index
    %c2_50 = arith.constant 2 : index
    %c0_51 = arith.constant 0 : index
    %c0_52 = arith.constant 0 : index
    %84 = vector.load %arg5[%c0_49, %c2_50, %c0_51, %c0_52] : memref<1x8x18x18xf32, #tpu.memory_space<vmem>>, vector<1x1x18x18xf32>
    %85 = vector.shape_cast %84 : vector<1x1x18x18xf32> to vector<18x18xf32>
    %86 = vector.shape_cast %83 : vector<18x18xf32> to vector<1x1x18x18xf32>
    tpu.vector_store %arg5[%c0_49, %c2_50, %c0_51, %c0_52], %86 {strides = array<i32>} : memref<1x8x18x18xf32, #tpu.memory_space<vmem>>, vector<1x1x18x18xf32>,
    %c3 = arith.constant 3 : index
    %87 = memref.load %arg3[%c3] : memref<8xf32, #tpu.memory_space<smem>>
    %c3_53 = arith.constant 3 : index
    %c0_54 = arith.constant 0 : index
    %88 = memref.load %arg2[%c3_53, %c0_54] : memref<8x3xf32, #tpu.memory_space<smem>>
    %89 = vector.broadcast %88 : f32 to vector<18x18xf32>
    %90 = arith.mulf %89, %1 : vector<18x18xf32>
    %91 = vector.broadcast %87 : f32 to vector<18x18xf32>
    %92 = arith.addf %91, %90 : vector<18x18xf32>
    %c3_55 = arith.constant 3 : index
    %c1_56 = arith.constant 1 : index
    %93 = memref.load %arg2[%c3_55, %c1_56] : memref<8x3xf32, #tpu.memory_space<smem>>
    %94 = vector.broadcast %93 : f32 to vector<18x18xf32>
    %95 = arith.mulf %94, %3 : vector<18x18xf32>
    %96 = arith.addf %92, %95 : vector<18x18xf32>
    %c3_57 = arith.constant 3 : index
    %c2_58 = arith.constant 2 : index
    %97 = memref.load %arg2[%c3_57, %c2_58] : memref<8x3xf32, #tpu.memory_space<smem>>
    %98 = vector.broadcast %97 : f32 to vector<18x18xf32>
    %99 = arith.mulf %98, %5 : vector<18x18xf32>
    %100 = arith.addf %96, %99 : vector<18x18xf32>
    %cst_59 = arith.constant 3.000000e+00 : f32
    %101 = vector.broadcast %cst_59 : f32 to vector<18x18xf32>
    %102 = arith.addf %101, %100 : vector<18x18xf32>
    %cst_60 = arith.constant 0.000000e+00 : f32
    %103 = vector.broadcast %cst_60 : f32 to vector<18x18xf32>
    %104 = arith.maximumf %100, %103 : vector<18x18xf32>
    %cst_61 = arith.constant 6.000000e+00 : f32
    %105 = vector.broadcast %cst_61 : f32 to vector<18x18xf32>
    %106 = arith.minimumf %100, %105 : vector<18x18xf32>
    %107 = arith.addf %102, %106 : vector<18x18xf32>
    %108 = arith.mulf %104, %107 : vector<18x18xf32>
    %cst_62 = arith.constant 0.166666672 : f32
    %109 = vector.broadcast %cst_62 : f32 to vector<18x18xf32>
    %110 = arith.mulf %108, %109 : vector<18x18xf32>
    %c0_63 = arith.constant 0 : index
    %c3_64 = arith.constant 3 : index
    %c0_65 = arith.constant 0 : index
    %c0_66 = arith.constant 0 : index
    %111 = vector.load %arg5[%c0_63, %c3_64, %c0_65, %c0_66] : memref<1x8x18x18xf32, #tpu.memory_space<vmem>>, vector<1x1x18x18xf32>
    %112 = vector.shape_cast %111 : vector<1x1x18x18xf32> to vector<18x18xf32>
    %113 = vector.shape_cast %110 : vector<18x18xf32> to vector<1x1x18x18xf32>
    tpu.vector_store %arg5[%c0_63, %c3_64, %c0_65, %c0_66], %113 {strides = array<i32>} : memref<1x8x18x18xf32, #tpu.memory_space<vmem>>, vector<1x1x18x18xf32>,
    %c4 = arith.constant 4 : index
    %114 = memref.load %arg3[%c4] : memref<8xf32, #tpu.memory_space<smem>>
    %c4_67 = arith.constant 4 : index
    %c0_68 = arith.constant 0 : index
    %115 = memref.load %arg2[%c4_67, %c0_68] : memref<8x3xf32, #tpu.memory_space<smem>>
    %116 = vector.broadcast %115 : f32 to vector<18x18xf32>
    %117 = arith.mulf %116, %1 : vector<18x18xf32>
    %118 = vector.broadcast %114 : f32 to vector<18x18xf32>
    %119 = arith.addf %118, %117 : vector<18x18xf32>
    %c4_69 = arith.constant 4 : index
    %c1_70 = arith.constant 1 : index
    %120 = memref.load %arg2[%c4_69, %c1_70] : memref<8x3xf32, #tpu.memory_space<smem>>
    %121 = vector.broadcast %120 : f32 to vector<18x18xf32>
    %122 = arith.mulf %121, %3 : vector<18x18xf32>
    %123 = arith.addf %119, %122 : vector<18x18xf32>
    %c4_71 = arith.constant 4 : index
    %c2_72 = arith.constant 2 : index
    %124 = memref.load %arg2[%c4_71, %c2_72] : memref<8x3xf32, #tpu.memory_space<smem>>
    %125 = vector.broadcast %124 : f32 to vector<18x18xf32>
    %126 = arith.mulf %125, %5 : vector<18x18xf32>
    %127 = arith.addf %123, %126 : vector<18x18xf32>
    %cst_73 = arith.constant 3.000000e+00 : f32
    %128 = vector.broadcast %cst_73 : f32 to vector<18x18xf32>
    %129 = arith.addf %128, %127 : vector<18x18xf32>
    %cst_74 = arith.constant 0.000000e+00 : f32
    %130 = vector.broadcast %cst_74 : f32 to vector<18x18xf32>
    %131 = arith.maximumf %127, %130 : vector<18x18xf32>
    %cst_75 = arith.constant 6.000000e+00 : f32
    %132 = vector.broadcast %cst_75 : f32 to vector<18x18xf32>
    %133 = arith.minimumf %127, %132 : vector<18x18xf32>
    %134 = arith.addf %129, %133 : vector<18x18xf32>
    %135 = arith.mulf %131, %134 : vector<18x18xf32>
    %cst_76 = arith.constant 0.166666672 : f32
    %136 = vector.broadcast %cst_76 : f32 to vector<18x18xf32>
    %137 = arith.mulf %135, %136 : vector<18x18xf32>
    %c0_77 = arith.constant 0 : index
    %c4_78 = arith.constant 4 : index
    %c0_79 = arith.constant 0 : index
    %c0_80 = arith.constant 0 : index
    %138 = vector.load %arg5[%c0_77, %c4_78, %c0_79, %c0_80] : memref<1x8x18x18xf32, #tpu.memory_space<vmem>>, vector<1x1x18x18xf32>
    %139 = vector.shape_cast %138 : vector<1x1x18x18xf32> to vector<18x18xf32>
    %140 = vector.shape_cast %137 : vector<18x18xf32> to vector<1x1x18x18xf32>
    tpu.vector_store %arg5[%c0_77, %c4_78, %c0_79, %c0_80], %140 {strides = array<i32>} : memref<1x8x18x18xf32, #tpu.memory_space<vmem>>, vector<1x1x18x18xf32>,
    %c5 = arith.constant 5 : index
    %141 = memref.load %arg3[%c5] : memref<8xf32, #tpu.memory_space<smem>>
    %c5_81 = arith.constant 5 : index
    %c0_82 = arith.constant 0 : index
    %142 = memref.load %arg2[%c5_81, %c0_82] : memref<8x3xf32, #tpu.memory_space<smem>>
    %143 = vector.broadcast %142 : f32 to vector<18x18xf32>
    %144 = arith.mulf %143, %1 : vector<18x18xf32>
    %145 = vector.broadcast %141 : f32 to vector<18x18xf32>
    %146 = arith.addf %145, %144 : vector<18x18xf32>
    %c5_83 = arith.constant 5 : index
    %c1_84 = arith.constant 1 : index
    %147 = memref.load %arg2[%c5_83, %c1_84] : memref<8x3xf32, #tpu.memory_space<smem>>
    %148 = vector.broadcast %147 : f32 to vector<18x18xf32>
    %149 = arith.mulf %148, %3 : vector<18x18xf32>
    %150 = arith.addf %146, %149 : vector<18x18xf32>
    %c5_85 = arith.constant 5 : index
    %c2_86 = arith.constant 2 : index
    %151 = memref.load %arg2[%c5_85, %c2_86] : memref<8x3xf32, #tpu.memory_space<smem>>
    %152 = vector.broadcast %151 : f32 to vector<18x18xf32>
    %153 = arith.mulf %152, %5 : vector<18x18xf32>
    %154 = arith.addf %150, %153 : vector<18x18xf32>
    %cst_87 = arith.constant 3.000000e+00 : f32
    %155 = vector.broadcast %cst_87 : f32 to vector<18x18xf32>
    %156 = arith.addf %155, %154 : vector<18x18xf32>
    %cst_88 = arith.constant 0.000000e+00 : f32
    %157 = vector.broadcast %cst_88 : f32 to vector<18x18xf32>
    %158 = arith.maximumf %154, %157 : vector<18x18xf32>
    %cst_89 = arith.constant 6.000000e+00 : f32
    %159 = vector.broadcast %cst_89 : f32 to vector<18x18xf32>
    %160 = arith.minimumf %154, %159 : vector<18x18xf32>
    %161 = arith.addf %156, %160 : vector<18x18xf32>
    %162 = arith.mulf %158, %161 : vector<18x18xf32>
    %cst_90 = arith.constant 0.166666672 : f32
    %163 = vector.broadcast %cst_90 : f32 to vector<18x18xf32>
    %164 = arith.mulf %162, %163 : vector<18x18xf32>
    %c0_91 = arith.constant 0 : index
    %c5_92 = arith.constant 5 : index
    %c0_93 = arith.constant 0 : index
    %c0_94 = arith.constant 0 : index
    %165 = vector.load %arg5[%c0_91, %c5_92, %c0_93, %c0_94] : memref<1x8x18x18xf32, #tpu.memory_space<vmem>>, vector<1x1x18x18xf32>
    %166 = vector.shape_cast %165 : vector<1x1x18x18xf32> to vector<18x18xf32>
    %167 = vector.shape_cast %164 : vector<18x18xf32> to vector<1x1x18x18xf32>
    tpu.vector_store %arg5[%c0_91, %c5_92, %c0_93, %c0_94], %167 {strides = array<i32>} : memref<1x8x18x18xf32, #tpu.memory_space<vmem>>, vector<1x1x18x18xf32>,
    %c6 = arith.constant 6 : index
    %168 = memref.load %arg3[%c6] : memref<8xf32, #tpu.memory_space<smem>>
    %c6_95 = arith.constant 6 : index
    %c0_96 = arith.constant 0 : index
    %169 = memref.load %arg2[%c6_95, %c0_96] : memref<8x3xf32, #tpu.memory_space<smem>>
    %170 = vector.broadcast %169 : f32 to vector<18x18xf32>
    %171 = arith.mulf %170, %1 : vector<18x18xf32>
    %172 = vector.broadcast %168 : f32 to vector<18x18xf32>
    %173 = arith.addf %172, %171 : vector<18x18xf32>
    %c6_97 = arith.constant 6 : index
    %c1_98 = arith.constant 1 : index
    %174 = memref.load %arg2[%c6_97, %c1_98] : memref<8x3xf32, #tpu.memory_space<smem>>
    %175 = vector.broadcast %174 : f32 to vector<18x18xf32>
    %176 = arith.mulf %175, %3 : vector<18x18xf32>
    %177 = arith.addf %173, %176 : vector<18x18xf32>
    %c6_99 = arith.constant 6 : index
    %c2_100 = arith.constant 2 : index
    %178 = memref.load %arg2[%c6_99, %c2_100] : memref<8x3xf32, #tpu.memory_space<smem>>
    %179 = vector.broadcast %178 : f32 to vector<18x18xf32>
    %180 = arith.mulf %179, %5 : vector<18x18xf32>
    %181 = arith.addf %177, %180 : vector<18x18xf32>
    %cst_101 = arith.constant 3.000000e+00 : f32
    %182 = vector.broadcast %cst_101 : f32 to vector<18x18xf32>
    %183 = arith.addf %182, %181 : vector<18x18xf32>
    %cst_102 = arith.constant 0.000000e+00 : f32
    %184 = vector.broadcast %cst_102 : f32 to vector<18x18xf32>
    %185 = arith.maximumf %181, %184 : vector<18x18xf32>
    %cst_103 = arith.constant 6.000000e+00 : f32
    %186 = vector.broadcast %cst_103 : f32 to vector<18x18xf32>
    %187 = arith.minimumf %181, %186 : vector<18x18xf32>
    %188 = arith.addf %183, %187 : vector<18x18xf32>
    %189 = arith.mulf %185, %188 : vector<18x18xf32>
    %cst_104 = arith.constant 0.166666672 : f32
    %190 = vector.broadcast %cst_104 : f32 to vector<18x18xf32>
    %191 = arith.mulf %189, %190 : vector<18x18xf32>
    %c0_105 = arith.constant 0 : index
    %c6_106 = arith.constant 6 : index
    %c0_107 = arith.constant 0 : index
    %c0_108 = arith.constant 0 : index
    %192 = vector.load %arg5[%c0_105, %c6_106, %c0_107, %c0_108] : memref<1x8x18x18xf32, #tpu.memory_space<vmem>>, vector<1x1x18x18xf32>
    %193 = vector.shape_cast %192 : vector<1x1x18x18xf32> to vector<18x18xf32>
    %194 = vector.shape_cast %191 : vector<18x18xf32> to vector<1x1x18x18xf32>
    tpu.vector_store %arg5[%c0_105, %c6_106, %c0_107, %c0_108], %194 {strides = array<i32>} : memref<1x8x18x18xf32, #tpu.memory_space<vmem>>, vector<1x1x18x18xf32>,
    %c7 = arith.constant 7 : index
    %195 = memref.load %arg3[%c7] : memref<8xf32, #tpu.memory_space<smem>>
    %c7_109 = arith.constant 7 : index
    %c0_110 = arith.constant 0 : index
    %196 = memref.load %arg2[%c7_109, %c0_110] : memref<8x3xf32, #tpu.memory_space<smem>>
    %197 = vector.broadcast %196 : f32 to vector<18x18xf32>
    %198 = arith.mulf %197, %1 : vector<18x18xf32>
    %199 = vector.broadcast %195 : f32 to vector<18x18xf32>
    %200 = arith.addf %199, %198 : vector<18x18xf32>
    %c7_111 = arith.constant 7 : index
    %c1_112 = arith.constant 1 : index
    %201 = memref.load %arg2[%c7_111, %c1_112] : memref<8x3xf32, #tpu.memory_space<smem>>
    %202 = vector.broadcast %201 : f32 to vector<18x18xf32>
    %203 = arith.mulf %202, %3 : vector<18x18xf32>
    %204 = arith.addf %200, %203 : vector<18x18xf32>
    %c7_113 = arith.constant 7 : index
    %c2_114 = arith.constant 2 : index
    %205 = memref.load %arg2[%c7_113, %c2_114] : memref<8x3xf32, #tpu.memory_space<smem>>
    %206 = vector.broadcast %205 : f32 to vector<18x18xf32>
    %207 = arith.mulf %206, %5 : vector<18x18xf32>
    %208 = arith.addf %204, %207 : vector<18x18xf32>
    %cst_115 = arith.constant 3.000000e+00 : f32
    %209 = vector.broadcast %cst_115 : f32 to vector<18x18xf32>
    %210 = arith.addf %209, %208 : vector<18x18xf32>
    %cst_116 = arith.constant 0.000000e+00 : f32
    %211 = vector.broadcast %cst_116 : f32 to vector<18x18xf32>
    %212 = arith.maximumf %208, %211 : vector<18x18xf32>
    %cst_117 = arith.constant 6.000000e+00 : f32
    %213 = vector.broadcast %cst_117 : f32 to vector<18x18xf32>
    %214 = arith.minimumf %208, %213 : vector<18x18xf32>
    %215 = arith.addf %210, %214 : vector<18x18xf32>
    %216 = arith.mulf %212, %215 : vector<18x18xf32>
    %cst_118 = arith.constant 0.166666672 : f32
    %217 = vector.broadcast %cst_118 : f32 to vector<18x18xf32>
    %218 = arith.mulf %216, %217 : vector<18x18xf32>
    %c0_119 = arith.constant 0 : index
    %c7_120 = arith.constant 7 : index
    %c0_121 = arith.constant 0 : index
    %c0_122 = arith.constant 0 : index
    %219 = vector.load %arg5[%c0_119, %c7_120, %c0_121, %c0_122] : memref<1x8x18x18xf32, #tpu.memory_space<vmem>>, vector<1x1x18x18xf32>
    %220 = vector.shape_cast %219 : vector<1x1x18x18xf32> to vector<18x18xf32>
    %221 = vector.shape_cast %218 : vector<18x18xf32> to vector<1x1x18x18xf32>
    tpu.vector_store %arg5[%c0_119, %c7_120, %c0_121, %c0_122], %221 {strides = array<i32>} : memref<1x8x18x18xf32, #tpu.memory_space<vmem>>, vector<1x1x18x18xf32>,
    return
  }
  func.func @transform_0(%arg0: i32, %arg1: i32) -> (i32, i32) {
    %c0_i32 = arith.constant 0 : i32
    %c0_i32_0 = arith.constant 0 : i32
    %c0_i32_1 = arith.constant 0 : i32
    return %c0_i32, %c0_i32_0 : i32, i32
  }
  func.func @transform_1(%arg0: i32, %arg1: i32) -> i32 {
    %c0_i32 = arith.constant 0 : i32
    %c0_i32_0 = arith.constant 0 : i32
    return %c0_i32 : i32
  }
  func.func @transform_2(%arg0: i32, %arg1: i32) -> (i32, i32, i32, i32) {
    %c0_i32 = arith.constant 0 : i32
    %c0_i32_0 = arith.constant 0 : i32
    %c0_i32_1 = arith.constant 0 : i32
    return %arg0, %c0_i32, %arg1, %c0_i32_0 : i32, i32, i32, i32
  }
  func.func @transform_3(%arg0: i32, %arg1: i32) -> (i32, i32, i32, i32) {
    %c0_i32 = arith.constant 0 : i32
    %c0_i32_0 = arith.constant 0 : i32
    %c0_i32_1 = arith.constant 0 : i32
    return %arg0, %c0_i32, %arg1, %c0_i32_0 : i32, i32, i32, i32
  }
}

</mosaic_0001>

<bundles_post_ra>
// kernel: tpu_custom_call.1
= control target key start
LH: loop header
LB: loop body
LE: loop exit
PB: predicated region body
PF: predicated region fallthrough
CT: control target
= control target key end

     0   :  { %8 = vsyncpa [#allocation3], 0  ;;  %s1220_s0 = inlined_call_operand.vmem [shape: f32[8,3], index: 0, kind: input, shape index: {}]   ;;  %s1221_s1 = inlined_call_operand.vmem [shape: f32[8], index: 1, kind: input, shape index: {}]   ;;  %s1222_s2 = inlined_call_operand.vmem [shape: f32[2,3,18,18], index: 2, kind: input, shape index: {}]   ;;  %s1223_s3 = inlined_call_operand.vmem [shape: f32[2,8,18,18], index: 3, kind: output, shape index: {}]  }
   0x1   :  { %9 = vsyncpa [#allocation5], 0  ;;  %s943_s12 = smov 0   ;;  %s945_s13 = smov 0  }
   0x2   :  { %s947_s14 = smov 0  }
   0x3 LB: > { %s742_s15 = sadd.s32 4294967295, %s919_s14   ;;  %s27_s16 = sadd.s32 1, %s915_s13  ;;  %s919_s14 = sphi %s947_s14, %s15_s14   ;;  %s915_s13 = sphi %s945_s13, %s1226_s13   ;;  %s911_s12 = sphi %s943_s12, %s1225_s12  }
   0x4   : > { %p29_p0 = scmp.ge.s32.totalorder %s27_s16, 2  ;;  %p744_p1 = scmp.ge.s32.totalorder %s919_s14, 1 }
   0x5   : > { %p130_p2 = scmp.lt.s32.totalorder %s919_s14, 3  ;;  %p964_p4 = scmp.eq.s32.totalorder %s742_s15, 0 }
   0x6   : > { %s1228_s16 = smov (%p29_p0, %s27_s16), 0  ;;  %s142_s20 = sshll.u32 %s1220_s0, 4  ;;  %s143_s20 = int_to_ptr.vmem [resolvable:$true] %s142_s20 }
   0x7   : > { %p131_p3 = pnand %p744_p1, %p130_p2  ;;  %s152_s23 = sshll.u32 %s1221_s1, 4  ;;  %s153_s23 = int_to_ptr.vmem [resolvable:$true] %s152_s23 }
   0x8   : > { %s921_s24 = smov [#allocation2]   ;;  %s922_s25 = smov [#allocation4]  }
   0x9   : > { %p822_p5 = pneg %p131_p3 }
   0xa   : > { %178 = sbr.rel (%p131_p3) target bundleno = 116 (0x74), region = 32 }
   0xb   : > { %p823_p6 = pnand %p964_p4, %p822_p5 }
   0xd   : > { %825 = dma.vmem_to_smem (!%p823_p6), %s143_s20, 128, %s921_s24, [#allocation3]  }
   0xe   : > { %828 = dma.vmem_to_smem (!%p823_p6), %s153_s23, 16, %s922_s25, [#allocation5]  }
   0xf   : > { %902 = dma.done.wait (%p964_p4), [#allocation3], 128  }
  0x10   : > { %904 = vsyncadd (%p964_p4), [#allocation3], 4294967168 }
  0x11   : > { %906 = dma.done.wait (%p964_p4), [#allocation5], 16  }
  0x12   : > { %908 = vsyncadd (%p964_p4), [#allocation5], 4294967280 }
  0x13   : > { %190 = sfence }
  0x14   : > { %p218_p7 = scmp.lt.s32.totalorder %s911_s12, 1  ;;  %s248_s26 = sld [smem:[#allocation4]]  ;;  %vm292_vm0 = vcmask 146432   ;;  %vm295_vm1 = vcmask 140288  }
  0x15   : > { %s249_s27 = sld [smem:[#allocation2]] }
  0x16   : > { %s1230_s12 = smov (!%p218_p7, %s911_s12), 1  ;;  %s759_s28 = sld [smem:[#allocation2 + $0x1]] }
  0x17   : > { %s812_s29 = smul.u32 72, %s1230_s12  ;;  %s760_s30 = sld [smem:[#allocation2 + $0x2]] }
  0x18   : > { %s989_s4 = sld [smem:[#allocation4 + $0x1]]  ;;  %s813_s17 = smul.u32 192, %s1230_s12 }
  0x19   : > { %s225_s7 = scalar_lea.vmem %s1222_s2, %s812_s29  ;;  %s762_s8 = sld [smem:[#allocation2 + $0x80]] }
  0x1a   : > { %v254_v0 = vstv %s248_s26  ;;  %v994_v1 = vld [vmem:[%s225_s7] sm:$0xff]  ;;  %v996_v2 = vld [vmem:[%s225_s7 + $0x18] sm:$0xff]  ;;  %v998_v3 = vld [vmem:[%s225_s7 + $0x30] sm:$0xff]  ;;  %s763_s9 = sld [smem:[#allocation2 + $0x81]]  ;;  %s1040_s21 = scalar_lea.vmem %s1223_s3, %s813_s17 }
  0x1b   : > { %v250_v4 = vstv %s249_s27  ;;  %v1001_v6 = vld [vmem:[%s225_s7 + $0x8] sm:$0xff]  ;;  %v1003_v7 = vld [vmem:[%s225_s7 + $0x20] sm:$0xff]  ;;  %v1005_v8 = vld [vmem:[%s225_s7 + $0x38] sm:$0xff]  ;;  %s764_s10 = sld [smem:[#allocation2 + $0x82]] }
  0x1c   : > { %v251_v5 = vmul.f32 %v250_v4, %v994_v1  ;;  %v259_v9 = vstv %s759_s28  ;;  %v252_v10 = vmul.f32 %v250_v4, %v1001_v6  ;;  %v1008_v11 = vld [vmem:[%s225_s7 + $0x10] sm:$0x3]  ;;  %v1010_v12 = vld [vmem:[%s225_s7 + $0x28] sm:$0x3]  ;;  %v1012_v13 = vld [vmem:[%s225_s7 + $0x40] sm:$0x3] }
  0x1d   : > { %v260_v15 = vmul.f32 %v996_v2, %v259_v9  ;;  %v267_v16 = vstv %s760_s30  ;;  %v261_v17 = vmul.f32 %v1003_v7, %v259_v9  ;;  %v253_v21 = vmul.f32 %v250_v4, %v1008_v11  ;;  %s1025_s11 = sld [smem:[#allocation4 + $0x2]] }
  0x1e   : > { %v255_v14 = vadd.f32 %v254_v0, %v251_v5  ;;  %v268_v18 = vmul.f32 %v998_v3, %v267_v16  ;;  %v256_v19 = vadd.f32 %v254_v0, %v252_v10  ;;  %v269_v20 = vmul.f32 %v1005_v8, %v267_v16  ;;  %s1028_s15 = sld [smem:[#allocation2 + $0x100]] }
  0x1f   : > { %v262_v23 = vmul.f32 %v1010_v12, %v259_v9  ;;  %v270_v24 = vmul.f32 %v1012_v13, %v267_v16  ;;  %v299_v25 = vstv %s762_s8  ;;  %v257_v27 = vadd.f32 %v254_v0, %v253_v21  ;;  %s1032_s18 = sld [smem:[#allocation2 + $0x101]] }
  0x20   : > { %v263_v22 = vadd.f32 %v260_v15, %v255_v14  ;;  %v264_v26 = vadd.f32 %v261_v17, %v256_v19  ;;  %v300_v28 = vmul.f32 %v299_v25, %v994_v1  ;;  %v303_v29 = vstv %s989_s4  ;;  %s1034_s19 = sld [smem:[#allocation2 + $0x102]] }
  0x21   : > { %v308_v31 = vstv %s763_s9  ;;  %v316_v32 = vstv %s764_s10  ;;  %v301_v33 = vmul.f32 %v299_v25, %v1001_v6  ;;  %v265_v35 = vadd.f32 %v262_v23, %v257_v27  ;;  %s1044_s22 = sld [smem:[#allocation4 + $0x3]] }
  0x22   : > { %v271_v30 = vadd.f32 %v268_v18, %v263_v22  ;;  %v272_v34 = vadd.f32 %v269_v20, %v264_v26  ;;  %v304_v36 = vadd.f32 %v303_v29, %v300_v28  ;;  %v309_v37 = vmul.f32 %v996_v2, %v308_v31  ;;  %s1051_s23 = sld [smem:[#allocation2 + $0x180]] }
  0x23   : > { %v317_v41 = vmul.f32 %v998_v3, %v316_v32  ;;  %v273_v45 = vadd.f32 %v270_v24, %v265_v35  ;;  %v305_v48 = vadd.f32 %v303_v29, %v301_v33  ;;  %v310_v49 = vmul.f32 %v1003_v7, %v308_v31  ;;  %s1063_s24 = sld [smem:[#allocation2 + $0x181]] }
  0x24   : > { %v274_v38 = vadd.f32 3.0, %v271_v30  ;;  %v277_v39 = vmax.f32 %v271_v30, 0.0  ;;  %v280_v40 = vmin.f32 %v271_v30, 6.0  ;;  %v275_v42 = vadd.f32 3.0, %v272_v34  ;;  %s1067_s25 = sld [smem:[#allocation2 + $0x182]] }
  0x25   : > { %v278_v43 = vmax.f32 %v272_v34, 0.0  ;;  %v281_v44 = vmin.f32 %v272_v34, 6.0  ;;  %v312_v47 = vadd.f32 %v309_v37, %v304_v36  ;;  %v276_v51 = vadd.f32 3.0, %v273_v45  ;;  %s1079_s26 = sld [smem:[#allocation2 + $0x200]] }
  0x26   : > { %v283_v46 = vadd.f32 %v280_v40, %v274_v38  ;;  %v279_v52 = vmax.f32 %v273_v45, 0.0  ;;  %v282_v53 = vmin.f32 %v273_v45, 6.0  ;;  %v313_v56 = vadd.f32 %v310_v49, %v305_v48  ;;  %s1081_s27 = sld [smem:[#allocation4 + $0x4]] }
  0x27   : > { %v284_v50 = vadd.f32 %v281_v44, %v275_v42  ;;  %v320_v55 = vadd.f32 %v317_v41, %v312_v47  ;;  %v318_v57 = vmul.f32 %v1005_v8, %v316_v32  ;;  %v302_v60 = vmul.f32 %v299_v25, %v1008_v11  ;;  %s1086_s28 = sld [smem:[#allocation2 + $0x201]] }
  0x28   : > { %v286_v54 = vmul.f32 %v283_v46, %v277_v39  ;;  %v285_v59 = vadd.f32 %v282_v53, %v276_v51  ;;  %v311_v61 = vmul.f32 %v1010_v12, %v308_v31  ;;  %v319_v16 = vmul.f32 %v1012_v13, %v316_v32  ;;  %s1093_s29 = sld [smem:[#allocation2 + $0x202]] }
  0x29   : > { %v287_v58 = vmul.f32 %v284_v50, %v278_v43  ;;  %v323_v63 = vadd.f32 3.0, %v320_v55  ;;  %v326_v0 = vmax.f32 %v320_v55, 0.0  ;;  %v329_v4 = vmin.f32 %v320_v55, 6.0  ;;  %s1106_s30 = sld [smem:[#allocation2 + $0x280]] }
  0x2a   : > { %v289_v62 = vmul.f32 0.16666667, %v286_v54  ;;  %v288_v9 = vmul.f32 %v285_v59, %v279_v52  ;;  %v321_v10 = vadd.f32 %v318_v57, %v313_v56  ;;  %v306_v14 = vadd.f32 %v303_v29, %v302_v60  ;;  %s1109_s4 = sld [smem:[#allocation4 + $0x5]] }
  0x2b   : > { %v290_v5 = vmul.f32 0.16666667, %v287_v58  ;;  %v332_v15 = vadd.f32 %v329_v4, %v323_v63  ;;  %v347_v17 = vstv %s1028_s15  ;;  %v351_v18 = vstv %s1025_s11  ;;  %s1111_s5 = sld [smem:[#allocation2 + $0x281]] }
  0x2c   : > { %293 = vst.msk [vmem:[%s1040_s21] sm:$0xff] %vm292_vm0, %v289_v62  ;;  %v291_v19 = vmul.f32 0.16666667, %v288_v9  ;;  %v324_v20 = vadd.f32 3.0, %v321_v10  ;;  %v327_v21 = vmax.f32 %v321_v10, 0.0  ;;  %v330_v22 = vmin.f32 %v321_v10, 6.0 }
  0x2d   : > { %294 = vst.msk [vmem:[%s1040_s21 + $0x8] sm:$0xff] %vm292_vm0, %v290_v5  ;;  %v335_v23 = vmul.f32 %v332_v15, %v326_v0  ;;  %v314_v24 = vadd.f32 %v311_v61, %v306_v14  ;;  %v348_v25 = vmul.f32 %v347_v17, %v994_v1  ;;  %v356_v26 = vstv %s1032_s18  ;;  %s1118_s6 = sld [smem:[#allocation2 + $0x282]] }
  0x2e   : > { %296 = vst.msk [vmem:[%s1040_s21 + $0x10] sm:$0x3] %vm295_vm1, %v291_v19  ;;  %v333_v27 = vadd.f32 %v330_v22, %v324_v20  ;;  %v357_v28 = vmul.f32 %v996_v2, %v356_v26  ;;  %v364_v29 = vstv %s1034_s19  ;;  %v349_v30 = vmul.f32 %v347_v17, %v1001_v6  ;;  %s1133_s7 = sld [smem:[#allocation2 + $0x300]] }
  0x2f   : > { %v338_v31 = vmul.f32 0.16666667, %v335_v23  ;;  %v322_v32 = vadd.f32 %v319_v16, %v314_v24  ;;  %v352_v33 = vadd.f32 %v351_v18, %v348_v25  ;;  %v365_v34 = vmul.f32 %v998_v3, %v364_v29  ;;  %s1137_s8 = sld [smem:[#allocation4 + $0x6]] }
  0x30   : > { %v336_v35 = vmul.f32 %v333_v27, %v327_v21  ;;  %v353_v36 = vadd.f32 %v351_v18, %v349_v30  ;;  %v358_v37 = vmul.f32 %v1003_v7, %v356_v26  ;;  %v366_v38 = vmul.f32 %v1005_v8, %v364_v29  ;;  %s1139_s9 = sld [smem:[#allocation2 + $0x301]] }
  0x31   : > { %765 = vst.msk [vmem:[%s1040_s21 + $0x18] sm:$0xff] %vm292_vm0, %v338_v31  ;;  %v325_v39 = vadd.f32 3.0, %v322_v32  ;;  %v328_v40 = vmax.f32 %v322_v32, 0.0  ;;  %v331_v41 = vmin.f32 %v322_v32, 6.0  ;;  %v360_v42 = vadd.f32 %v357_v28, %v352_v33  ;;  %s1145_s10 = sld [smem:[#allocation2 + $0x302]] }
  0x32   : > { %v339_v43 = vmul.f32 0.16666667, %v336_v35  ;;  %v361_v44 = vadd.f32 %v358_v37, %v353_v36  ;;  %v350_v45 = vmul.f32 %v347_v17, %v1008_v11  ;;  %v359_v46 = vmul.f32 %v1010_v12, %v356_v26  ;;  %s1160_s11 = sld [smem:[#allocation2 + $0x380]] }
  0x33   : > { %v334_v47 = vadd.f32 %v331_v41, %v325_v39  ;;  %v368_v48 = vadd.f32 %v365_v34, %v360_v42  ;;  %v367_v49 = vmul.f32 %v1012_v13, %v364_v29  ;;  %v395_v50 = vstv %s1051_s23  ;;  %s1164_s15 = sld [smem:[#allocation4 + $0x7]] }
  0x34   : > { %766 = vst.msk [vmem:[%s1040_s21 + $0x20] sm:$0xff] %vm292_vm0, %v339_v43  ;;  %v369_v51 = vadd.f32 %v366_v38, %v361_v44  ;;  %v354_v52 = vadd.f32 %v351_v18, %v350_v45  ;;  %v396_v53 = vmul.f32 %v395_v50, %v994_v1  ;;  %v399_v54 = vstv %s1044_s22  ;;  %s1167_s17 = sld [smem:[#allocation2 + $0x381]] }
  0x35   : > { %v337_v55 = vmul.f32 %v334_v47, %v328_v40  ;;  %v371_v56 = vadd.f32 3.0, %v368_v48  ;;  %v374_v57 = vmax.f32 %v368_v48, 0.0  ;;  %v377_v58 = vmin.f32 %v368_v48, 6.0  ;;  %s1169_s18 = sld [smem:[#allocation2 + $0x382]] }
  0x36   : > { %v372_v59 = vadd.f32 3.0, %v369_v51  ;;  %v375_v60 = vmax.f32 %v369_v51, 0.0  ;;  %v378_v61 = vmin.f32 %v369_v51, 6.0  ;;  %v362_v62 = vadd.f32 %v359_v46, %v354_v52 }
  0x37   : > { %v340_v63 = vmul.f32 0.16666667, %v337_v55  ;;  %v380_v0 = vadd.f32 %v377_v58, %v371_v56  ;;  %v400_v4 = vadd.f32 %v399_v54, %v396_v53  ;;  %v404_v5 = vstv %s1063_s24 }
  0x38   : > { %v381_v9 = vadd.f32 %v378_v61, %v372_v59  ;;  %v370_v10 = vadd.f32 %v367_v49, %v362_v62  ;;  %v405_v14 = vmul.f32 %v996_v2, %v404_v5  ;;  %v412_v15 = vstv %s1067_s25 }
  0x39   : > { %767 = vst.msk [vmem:[%s1040_s21 + $0x28] sm:$0x3] %vm295_vm1, %v340_v63  ;;  %v383_v16 = vmul.f32 %v380_v0, %v374_v57  ;;  %v413_v17 = vmul.f32 %v998_v3, %v412_v15  ;;  %v397_v18 = vmul.f32 %v395_v50, %v1001_v6  ;;  %v406_v19 = vmul.f32 %v1003_v7, %v404_v5 }
  0x3a   : > { %v384_v20 = vmul.f32 %v381_v9, %v375_v60  ;;  %v373_v21 = vadd.f32 3.0, %v370_v10  ;;  %v376_v22 = vmax.f32 %v370_v10, 0.0  ;;  %v379_v23 = vmin.f32 %v370_v10, 6.0 }
  0x3b   : > { %v386_v24 = vmul.f32 0.16666667, %v383_v16  ;;  %v408_v25 = vadd.f32 %v405_v14, %v400_v4  ;;  %v401_v26 = vadd.f32 %v399_v54, %v397_v18  ;;  %v414_v27 = vmul.f32 %v1005_v8, %v412_v15 }
  0x3c   : > { %v387_v28 = vmul.f32 0.16666667, %v384_v20  ;;  %v382_v29 = vadd.f32 %v379_v23, %v373_v21  ;;  %v398_v30 = vmul.f32 %v395_v50, %v1008_v11  ;;  %v407_v31 = vmul.f32 %v1010_v12, %v404_v5 }
  0x3d   : > { %772 = vst.msk [vmem:[%s1040_s21 + $0x30] sm:$0xff] %vm292_vm0, %v386_v24  ;;  %v416_v32 = vadd.f32 %v413_v17, %v408_v25  ;;  %v409_v33 = vadd.f32 %v406_v19, %v401_v26  ;;  %v415_v34 = vmul.f32 %v1012_v13, %v412_v15  ;;  %v443_v35 = vstv %s1079_s26 }
  0x3e   : > { %773 = vst.msk [vmem:[%s1040_s21 + $0x38] sm:$0xff] %vm292_vm0, %v387_v28  ;;  %v385_v36 = vmul.f32 %v382_v29, %v376_v22  ;;  %v402_v37 = vadd.f32 %v399_v54, %v398_v30  ;;  %v444_v38 = vmul.f32 %v443_v35, %v994_v1  ;;  %v447_v39 = vstv %s1081_s27 }
  0x3f   : > { %v419_v40 = vadd.f32 3.0, %v416_v32  ;;  %v422_v41 = vmax.f32 %v416_v32, 0.0  ;;  %v425_v42 = vmin.f32 %v416_v32, 6.0  ;;  %v417_v43 = vadd.f32 %v414_v27, %v409_v33 }
  0x40   : > { %v388_v44 = vmul.f32 0.16666667, %v385_v36  ;;  %v410_v45 = vadd.f32 %v407_v31, %v402_v37  ;;  %v448_v46 = vadd.f32 %v447_v39, %v444_v38  ;;  %v452_v47 = vstv %s1086_s28 }
  0x41   : > { %v428_v48 = vadd.f32 %v425_v42, %v419_v40  ;;  %v420_v49 = vadd.f32 3.0, %v417_v43  ;;  %v423_v50 = vmax.f32 %v417_v43, 0.0  ;;  %v426_v51 = vmin.f32 %v417_v43, 6.0 }
  0x42   : > { %774 = vst.msk [vmem:[%s1040_s21 + $0x40] sm:$0x3] %vm295_vm1, %v388_v44  ;;  %v418_v52 = vadd.f32 %v415_v34, %v410_v45  ;;  %v453_v53 = vmul.f32 %v996_v2, %v452_v47  ;;  %v460_v54 = vstv %s1093_s29  ;;  %v445_v55 = vmul.f32 %v443_v35, %v1001_v6 }
  0x43   : > { %v431_v56 = vmul.f32 %v428_v48, %v422_v41  ;;  %v429_v57 = vadd.f32 %v426_v51, %v420_v49  ;;  %v461_v58 = vmul.f32 %v998_v3, %v460_v54  ;;  %v454_v59 = vmul.f32 %v1003_v7, %v452_v47 }
  0x44   : > { %v421_v60 = vadd.f32 3.0, %v418_v52  ;;  %v424_v61 = vmax.f32 %v418_v52, 0.0  ;;  %v427_v62 = vmin.f32 %v418_v52, 6.0  ;;  %v456_v63 = vadd.f32 %v453_v53, %v448_v46 }
  0x45   : > { %v434_v0 = vmul.f32 0.16666667, %v431_v56  ;;  %v432_v4 = vmul.f32 %v429_v57, %v423_v50  ;;  %v449_v5 = vadd.f32 %v447_v39, %v445_v55  ;;  %v462_v9 = vmul.f32 %v1005_v8, %v460_v54 }
  0x46   : > { %v430_v10 = vadd.f32 %v427_v62, %v421_v60  ;;  %v464_v14 = vadd.f32 %v461_v58, %v456_v63  ;;  %v446_v15 = vmul.f32 %v443_v35, %v1008_v11  ;;  %v455_v16 = vmul.f32 %v1010_v12, %v452_v47 }
  0x47   : > { %779 = vst.msk [vmem:[%s1040_s21 + $0x48] sm:$0xff] %vm292_vm0, %v434_v0  ;;  %v435_v17 = vmul.f32 0.16666667, %v432_v4  ;;  %v457_v18 = vadd.f32 %v454_v59, %v449_v5  ;;  %v463_v19 = vmul.f32 %v1012_v13, %v460_v54  ;;  %v491_v20 = vstv %s1106_s30 }
  0x48   : > { %v433_v21 = vmul.f32 %v430_v10, %v424_v61  ;;  %v467_v22 = vadd.f32 3.0, %v464_v14  ;;  %v470_v23 = vmax.f32 %v464_v14, 0.0  ;;  %v473_v24 = vmin.f32 %v464_v14, 6.0 }
  0x49   : > { %780 = vst.msk [vmem:[%s1040_s21 + $0x50] sm:$0xff] %vm292_vm0, %v435_v17  ;;  %v465_v25 = vadd.f32 %v462_v9, %v457_v18  ;;  %v450_v26 = vadd.f32 %v447_v39, %v446_v15  ;;  %v492_v27 = vmul.f32 %v491_v20, %v994_v1  ;;  %v495_v28 = vstv %s1109_s4 }
  0x4a   : > { %v436_v29 = vmul.f32 0.16666667, %v433_v21  ;;  %v476_v30 = vadd.f32 %v473_v24, %v467_v22  ;;  %v500_v31 = vstv %s1111_s5  ;;  %v508_v32 = vstv %s1118_s6 }
  0x4b   : > { %v468_v33 = vadd.f32 3.0, %v465_v25  ;;  %v471_v34 = vmax.f32 %v465_v25, 0.0  ;;  %v474_v35 = vmin.f32 %v465_v25, 6.0  ;;  %v458_v36 = vadd.f32 %v455_v16, %v450_v26 }
  0x4c   : > { %781 = vst.msk [vmem:[%s1040_s21 + $0x58] sm:$0x3] %vm295_vm1, %v436_v29  ;;  %v479_v37 = vmul.f32 %v476_v30, %v470_v23  ;;  %v496_v38 = vadd.f32 %v495_v28, %v492_v27  ;;  %v501_v39 = vmul.f32 %v996_v2, %v500_v31  ;;  %v509_v40 = vmul.f32 %v998_v3, %v508_v32 }
  0x4d   : > { %v477_v41 = vadd.f32 %v474_v35, %v468_v33  ;;  %v466_v42 = vadd.f32 %v463_v19, %v458_v36  ;;  %v493_v43 = vmul.f32 %v491_v20, %v1001_v6  ;;  %v502_v44 = vmul.f32 %v1003_v7, %v500_v31 }
  0x4e   : > { %v482_v45 = vmul.f32 0.16666667, %v479_v37  ;;  %v504_v46 = vadd.f32 %v501_v39, %v496_v38  ;;  %v510_v47 = vmul.f32 %v1005_v8, %v508_v32  ;;  %v494_v48 = vmul.f32 %v491_v20, %v1008_v11 }
  0x4f   : > { %v480_v49 = vmul.f32 %v477_v41, %v471_v34  ;;  %v469_v50 = vadd.f32 3.0, %v466_v42  ;;  %v472_v51 = vmax.f32 %v466_v42, 0.0  ;;  %v475_v52 = vmin.f32 %v466_v42, 6.0 }
  0x50   : > { %786 = vst.msk [vmem:[%s1040_s21 + $0x60] sm:$0xff] %vm292_vm0, %v482_v45  ;;  %v512_v53 = vadd.f32 %v509_v40, %v504_v46  ;;  %v497_v54 = vadd.f32 %v495_v28, %v493_v43  ;;  %v498_v55 = vadd.f32 %v495_v28, %v494_v48  ;;  %v503_v56 = vmul.f32 %v1010_v12, %v500_v31 }
  0x51   : > { %v483_v57 = vmul.f32 0.16666667, %v480_v49  ;;  %v478_v58 = vadd.f32 %v475_v52, %v469_v50  ;;  %v511_v59 = vmul.f32 %v1012_v13, %v508_v32  ;;  %v539_v60 = vstv %s1133_s7 }
  0x52   : > { %v515_v61 = vadd.f32 3.0, %v512_v53  ;;  %v518_v62 = vmax.f32 %v512_v53, 0.0  ;;  %v521_v63 = vmin.f32 %v512_v53, 6.0  ;;  %v505_v0 = vadd.f32 %v502_v44, %v497_v54 }
  0x53   : > { %787 = vst.msk [vmem:[%s1040_s21 + $0x68] sm:$0xff] %vm292_vm0, %v483_v57  ;;  %v481_v4 = vmul.f32 %v478_v58, %v472_v51  ;;  %v506_v5 = vadd.f32 %v503_v56, %v498_v55  ;;  %v540_v9 = vmul.f32 %v539_v60, %v994_v1  ;;  %v543_v10 = vstv %s1137_s8 }
  0x54   : > { %v524_v14 = vadd.f32 %v521_v63, %v515_v61  ;;  %v513_v15 = vadd.f32 %v510_v47, %v505_v0  ;;  %v548_v16 = vstv %s1139_s9  ;;  %v556_v17 = vstv %s1145_s10 }
  0x55   : > { %v484_v18 = vmul.f32 0.16666667, %v481_v4  ;;  %v514_v19 = vadd.f32 %v511_v59, %v506_v5  ;;  %v544_v20 = vadd.f32 %v543_v10, %v540_v9  ;;  %v549_v21 = vmul.f32 %v996_v2, %v548_v16 }
  0x56   : > { %v527_v22 = vmul.f32 %v524_v14, %v518_v62  ;;  %v516_v23 = vadd.f32 3.0, %v513_v15  ;;  %v519_v24 = vmax.f32 %v513_v15, 0.0  ;;  %v522_v25 = vmin.f32 %v513_v15, 6.0 }
  0x57   : > { %788 = vst.msk [vmem:[%s1040_s21 + $0x70] sm:$0x3] %vm295_vm1, %v484_v18  ;;  %v517_v26 = vadd.f32 3.0, %v514_v19  ;;  %v520_v27 = vmax.f32 %v514_v19, 0.0  ;;  %v523_v28 = vmin.f32 %v514_v19, 6.0  ;;  %v552_v29 = vadd.f32 %v549_v21, %v544_v20 }
  0x58   : > { %v530_v30 = vmul.f32 0.16666667, %v527_v22  ;;  %v525_v31 = vadd.f32 %v522_v25, %v516_v23  ;;  %v557_v32 = vmul.f32 %v998_v3, %v556_v17  ;;  %v541_v33 = vmul.f32 %v539_v60, %v1001_v6 }
  0x59   : > { %v526_v34 = vadd.f32 %v523_v28, %v517_v26  ;;  %v550_v35 = vmul.f32 %v1003_v7, %v548_v16  ;;  %v558_v36 = vmul.f32 %v1005_v8, %v556_v17  ;;  %v542_v37 = vmul.f32 %v539_v60, %v1008_v11 }
  0x5a   : > { %793 = vst.msk [vmem:[%s1040_s21 + $0x78] sm:$0xff] %vm292_vm0, %v530_v30  ;;  %v528_v38 = vmul.f32 %v525_v31, %v519_v24  ;;  %v560_v39 = vadd.f32 %v557_v32, %v552_v29  ;;  %v545_v40 = vadd.f32 %v543_v10, %v541_v33  ;;  %v551_v41 = vmul.f32 %v1010_v12, %v548_v16 }
  0x5b   : > { %v529_v42 = vmul.f32 %v526_v34, %v520_v27  ;;  %v546_v43 = vadd.f32 %v543_v10, %v542_v37  ;;  %v559_v44 = vmul.f32 %v1012_v13, %v556_v17  ;;  %v587_v45 = vstv %s1160_s11 }
  0x5c   : > { %v531_v46 = vmul.f32 0.16666667, %v528_v38  ;;  %v563_v47 = vadd.f32 3.0, %v560_v39  ;;  %v566_v48 = vmax.f32 %v560_v39, 0.0  ;;  %v569_v49 = vmin.f32 %v560_v39, 6.0 }
  0x5d   : > { %v532_v50 = vmul.f32 0.16666667, %v529_v42  ;;  %v553_v51 = vadd.f32 %v550_v35, %v545_v40  ;;  %v554_v52 = vadd.f32 %v551_v41, %v546_v43  ;;  %v588_v53 = vmul.f32 %v587_v45, %v994_v1 }
  0x5e   : > { %794 = vst.msk [vmem:[%s1040_s21 + $0x80] sm:$0xff] %vm292_vm0, %v531_v46  ;;  %v572_v54 = vadd.f32 %v569_v49, %v563_v47  ;;  %v591_v55 = vstv %s1164_s15  ;;  %v596_v56 = vstv %s1167_s17  ;;  %v604_v57 = vstv %s1169_s18 }
  0x5f   : > { %795 = vst.msk [vmem:[%s1040_s21 + $0x88] sm:$0x3] %vm295_vm1, %v532_v50  ;;  %v561_v58 = vadd.f32 %v558_v36, %v553_v51  ;;  %v562_v59 = vadd.f32 %v559_v44, %v554_v52  ;;  %v592_v60 = vadd.f32 %v591_v55, %v588_v53  ;;  %v597_v61 = vmul.f32 %v996_v2, %v596_v56 }
  0x60   : > { %v575_v62 = vmul.f32 %v572_v54, %v566_v48  ;;  %v605_v63 = vmul.f32 %v998_v3, %v604_v57  ;;  %v589_v0 = vmul.f32 %v587_v45, %v1001_v6  ;;  %v598_v1 = vmul.f32 %v1003_v7, %v596_v56 }
  0x61   : > { %v564_v4 = vadd.f32 3.0, %v561_v58  ;;  %v567_v5 = vmax.f32 %v561_v58, 0.0  ;;  %v570_v9 = vmin.f32 %v561_v58, 6.0  ;;  %v565_v10 = vadd.f32 3.0, %v562_v59 }
  0x62   : > { %v578_v14 = vmul.f32 0.16666667, %v575_v62  ;;  %v568_v15 = vmax.f32 %v562_v59, 0.0  ;;  %v571_v16 = vmin.f32 %v562_v59, 6.0  ;;  %v600_v17 = vadd.f32 %v597_v61, %v592_v60 }
  0x63   : > { %v573_v18 = vadd.f32 %v570_v9, %v564_v4  ;;  %v593_v19 = vadd.f32 %v591_v55, %v589_v0  ;;  %v606_v2 = vmul.f32 %v1005_v8, %v604_v57  ;;  %v590_v20 = vmul.f32 %v587_v45, %v1008_v11 }
  0x64   : > { %800 = vst.msk [vmem:[%s1040_s21 + $0x90] sm:$0xff] %vm292_vm0, %v578_v14  ;;  %v574_v3 = vadd.f32 %v571_v16, %v565_v10  ;;  %v608_v6 = vadd.f32 %v605_v63, %v600_v17  ;;  %v599_v7 = vmul.f32 %v1010_v12, %v596_v56  ;;  %v607_v24 = vmul.f32 %v1012_v13, %v604_v57 }
  0x65   : > { %v576_v21 = vmul.f32 %v573_v18, %v567_v5  ;;  %v601_v22 = vadd.f32 %v598_v1, %v593_v19  ;;  %v594_v23 = vadd.f32 %v591_v55, %v590_v20 }
  0x66   : > { %v577_v25 = vmul.f32 %v574_v3, %v568_v15  ;;  %v611_v26 = vadd.f32 3.0, %v608_v6  ;;  %v614_v27 = vmax.f32 %v608_v6, 0.0  ;;  %v617_v28 = vmin.f32 %v608_v6, 6.0 }
  0x67   : > { %v579_v8 = vmul.f32 0.16666667, %v576_v21  ;;  %v609_v29 = vadd.f32 %v606_v2, %v601_v22  ;;  %v602_v11 = vadd.f32 %v599_v7, %v594_v23 }
  0x68   : > { %v580_v30 = vmul.f32 0.16666667, %v577_v25  ;;  %v620_v31 = vadd.f32 %v617_v28, %v611_v26 }
  0x69   : > { %801 = vst.msk [vmem:[%s1040_s21 + $0x98] sm:$0xff] %vm292_vm0, %v579_v8  ;;  %v612_v32 = vadd.f32 3.0, %v609_v29  ;;  %v615_v12 = vmax.f32 %v609_v29, 0.0  ;;  %v618_v33 = vmin.f32 %v609_v29, 6.0  ;;  %v610_v34 = vadd.f32 %v607_v24, %v602_v11 }
  0x6a   : > { %802 = vst.msk [vmem:[%s1040_s21 + $0xa0] sm:$0x3] %vm295_vm1, %v580_v30  ;;  %v623_v13 = vmul.f32 %v620_v31, %v614_v27 }
  0x6b   : > { %v621_v35 = vadd.f32 %v618_v33, %v612_v32  ;;  %v613_v36 = vadd.f32 3.0, %v610_v34  ;;  %v616_v37 = vmax.f32 %v610_v34, 0.0  ;;  %v619_v38 = vmin.f32 %v610_v34, 6.0 }
  0x6c   : > { %v626_v39 = vmul.f32 0.16666667, %v623_v13 }
  0x6d   : > { %v624_v40 = vmul.f32 %v621_v35, %v615_v12  ;;  %v622_v41 = vadd.f32 %v619_v38, %v613_v36 }
  0x6e   : > { %807 = vst.msk [vmem:[%s1040_s21 + $0xa8] sm:$0xff] %vm292_vm0, %v626_v39 }
  0x6f   : > { %v627_v42 = vmul.f32 0.16666667, %v624_v40  ;;  %v625_v43 = vmul.f32 %v622_v41, %v616_v37 }
  0x71   : > { %808 = vst.msk [vmem:[%s1040_s21 + $0xb0] sm:$0xff] %vm292_vm0, %v627_v42  ;;  %v628_v44 = vmul.f32 0.16666667, %v625_v43 }
  0x73   : > { %809 = vst.msk [vmem:[%s1040_s21 + $0xb8] sm:$0x3] %vm295_vm1, %v628_v44 }
  0x74 PF: > { %s15_s14 = sadd.s32 1, %s919_s14   ;;  %s1225_s12 = smov %s915_s13 }
  0x75   : > { %p12_p8 = scmp.ge.s32.totalorder %s15_s14, 4   ;;  %s1226_s13 = smov %s1228_s16 }
  0x77   :  { %14 = sbr.rel (!%p12_p8) target bundleno = 3 (0x3), region = 80 }
  0x7c   :  { %663 = vsyncpa [#allocation3], 1 }
  0x7d   :  { %665 = vsyncpa [#allocation3 + $0x1], 1 }
  0x7e   :  { %666 = vsyncpa [#allocation5], 1 }

</bundles_post_ra>
